<compile_context>
chip_gen: v7x
topology: tpu7x:2x2x1
jax: 0.10.0
libtpu: 0.0.40
codegen_flags: <defaults>
</compile_context>

<pallas_src>
import functools
import math

import jax
import jax.numpy as jnp
from jax.experimental import pallas as pl
from jax.experimental.pallas import tpu as pltpu


_LANE = 128
_ROW_ALIGN = 16                # bf16 packs 2 rows per sublane
_FUSED_ROW_TILE = 256
_FALLBACK_ROW_TILE = 512


def _round_up(x, m):
    return ((x + m - 1) // m) * m


def _vmem_capacity_bytes():
    """Physical VMEM per TensorCore (64 MiB v7x, 128 MiB v5e/v6e)."""
    try:
        cap = getattr(pltpu.get_tpu_info(), "vmem_capacity_bytes", None)
        if cap:
            return int(cap)
    except Exception:
        pass
    return 64 * 1024 * 1024    # conservative default (v7x)


def _row_tiling(m, max_tile):
    """Pick (m_pad, tm): 16-aligned, tm | m_pad, and >=2 grid steps when possible."""
    m_aligned = _round_up(m, _ROW_ALIGN)
    if m_aligned <= _ROW_ALIGN:
        return m_aligned, m_aligned
    tm = min(max_tile, _round_up(m_aligned // 2, _ROW_ALIGN))
    m_pad = _round_up(m_aligned, tm)
    return m_pad, tm


def _apply_act(y, act, approx_gelu):
    """Activation on an f32 tile (f32 elementwise keeps v5e happy)."""
    if act is None:
        return y
    if act == "relu":
        return jnp.maximum(y, 0.0)
    if act == "gelu":
        if approx_gelu:
            # tanh approximation routes through the otherwise-idle EUP slot
            # (recommended on v5e when bit-matching PyTorch isn't required).
            return jax.nn.gelu(y, approximate=True)
        # Exact erf formulation == PyTorch nn.GELU() default.
        return 0.5 * y * (1.0 + jax.lax.erf(y * 0.7071067811865476))
    raise ValueError(f"activation {act} is not supported")


# ------------------------- fused whole-MLP kernel --------------------------
def _fused_mlp_kernel(*refs, n_layers, act, approx_gelu, compute_dtype):
    """refs = (x, w0, b0, w1, b1, ..., out). All layers run on one row tile."""
    x_ref, o_ref = refs[0], refs[-1]
    wb_refs = refs[1:-1]

    # In-kernel cast (free VPU work hidden under the first matmul).
    h = x_ref[...].astype(compute_dtype)             # (tm, K0_pad) bf16
    for i in range(n_layers):                        # static unroll over layers
        w = wb_refs[2 * i][...]                      # (K_pad, N_pad) bf16
        b = wb_refs[2 * i + 1][...]                  # (1, N_pad) f32
        y = jnp.dot(h, w, preferred_element_type=jnp.float32) + b
        if i < n_layers - 1:
            y = _apply_act(y, act, approx_gelu)      # f32 elementwise
            h = y.astype(compute_dtype)              # bf16 back into the MXU
        else:
            h = y
    o_ref[...] = h.astype(o_ref.dtype)


def _fused_mlp(x_pad, weights, biases, *, act, approx_gelu, out_dtype, tm,
               vmem_limit):
    m_pad, k0 = x_pad.shape
    n_layers = len(weights)
    n_last = weights[-1].shape[1]

    # Constant-index weights/biases: single-buffered (double-buffering would
    # only double their VMEM footprint).
    resident = pl.Buffered(buffer_count=1)

    in_specs = [pl.BlockSpec((tm, k0), lambda i: (i, 0))]
    args = [x_pad]
    for w, b in zip(weights, biases):
        kp, np_ = w.shape
        in_specs.append(pl.BlockSpec((kp, np_), lambda i: (0, 0),
                                     pipeline_mode=resident))
        in_specs.append(pl.BlockSpec((1, np_), lambda i: (0, 0),
                                     pipeline_mode=resident))
        args.extend([w, b])

    kernel = functools.partial(
        _fused_mlp_kernel, n_layers=n_layers, act=act,
        approx_gelu=approx_gelu, compute_dtype=weights[0].dtype)

    return pl.pallas_call(
        kernel,
        out_shape=jax.ShapeDtypeStruct((m_pad, n_last), out_dtype),
        grid_spec=pltpu.PrefetchScalarGridSpec(
            num_scalar_prefetch=0,
            grid=(m_pad // tm,),
            in_specs=in_specs,
            out_specs=pl.BlockSpec((tm, n_last), lambda i: (i, 0)),
        ),
        compiler_params=pltpu.CompilerParams(
            dimension_semantics=("parallel",),
            vmem_limit_bytes=int(vmem_limit)),
    )(*args)


# ---------------- per-layer tiled fallback (very large weights) -------------
# NOTE: a further improvement (not applied here) is a single pallas_call that
# keeps the (tm, hidden) activation VMEM-resident across layers and streams
# weights from HBM with manual double-buffered DMAs; with the raised fused
# budget this path only triggers for extremely large MLPs.
def _tiled_linear_kernel(x_ref, w_ref, b_ref, o_ref, acc_ref, *, act, approx_gelu):
    k = pl.program_id(2)

    @pl.when(k == 0)
    def _():
        acc_ref[...] = jnp.zeros_like(acc_ref)

    acc_ref[...] += jnp.dot(x_ref[...].astype(w_ref.dtype), w_ref[...],
                            preferred_element_type=jnp.float32)

    @pl.when(k == pl.num_programs(2) - 1)
    def _():
        y = acc_ref[...] + b_ref[...]
        y = _apply_act(y, act, approx_gelu)
        o_ref[...] = y.astype(o_ref.dtype)


def _pick_tile(dim, preferred):
    for t in preferred:
        if dim % t == 0:
            return t
    return dim


def _tiled_linear(x_pad, w, b, *, act, approx_gelu, out_dtype, tm, capacity):
    m_pad, kp = x_pad.shape
    np_ = w.shape[1]
    tn = _pick_tile(np_, (512, 256, 128))
    tk = _pick_tile(kp, (1024, 512, 256, 128))
    need = (2 * tm * tk * x_pad.dtype.itemsize
            + 2 * tk * tn * w.dtype.itemsize
            + 2 * tm * tn * jnp.dtype(out_dtype).itemsize
            + tm * tn * 4
            + (4 << 20))
    grid = (m_pad // tm, np_ // tn, kp // tk)
    return pl.pallas_call(
        functools.partial(_tiled_linear_kernel, act=act, approx_gelu=approx_gelu),
        out_shape=jax.ShapeDtypeStruct((m_pad, np_), out_dtype),
        grid_spec=pltpu.PrefetchScalarGridSpec(
            num_scalar_prefetch=0,
            grid=grid,
            in_specs=[pl.BlockSpec((tm, tk), lambda i, j, k: (i, k)),
                      pl.BlockSpec((tk, tn), lambda i, j, k: (k, j)),
                      pl.BlockSpec((1, tn), lambda i, j, k: (0, j))],
            out_specs=pl.BlockSpec((tm, tn), lambda i, j, k: (i, j)),
            scratch_shapes=[pltpu.VMEM((tm, tn), jnp.float32)],
        ),
        compiler_params=pltpu.CompilerParams(
            dimension_semantics=("parallel", "parallel", "arbitrary"),
            vmem_limit_bytes=int(min(capacity, max(need, 32 << 20))),
        ),
    )(x_pad, w, b)


# ----------------------------- parameter init ------------------------------
def init_mlp_params(key, in_dim, out_dim, hidden_list, param_dtype=jnp.bfloat16):
    """Xavier-uniform weights / zero biases, matching the PyTorch module.

    Weights are stored already transposed to (K, N), zero-padded so both dims
    are multiples of 128, and cast to bf16 (full-rate MXU inputs); biases are
    stored padded as (1, N_pad) in f32.
    """
    dims = [in_dim] + list(hidden_list) + [out_dim]
    params = []
    for i in range(len(dims) - 1):
        fan_in, fan_out = dims[i], dims[i + 1]
        key, sub = jax.random.split(key)
        a = math.sqrt(6.0 / (fan_in + fan_out))
        w = jax.random.uniform(sub, (fan_out, fan_in), jnp.float32, -a, a)
        kp, np_ = _round_up(fan_in, _LANE), _round_up(fan_out, _LANE)
        w_pad = jnp.zeros((kp, np_), jnp.float32).at[:fan_in, :fan_out].set(w.T)
        params.append({
            "w": w_pad.astype(param_dtype),          # (K_pad, N_pad), pre-transposed
            "b": jnp.zeros((1, np_), jnp.float32),
            "in_dim": fan_in,
            "out_dim": fan_out,
        })
    return params


# ------------------------------- MLP forward -------------------------------
def mlp_forward(x, params, act="gelu", approx_gelu=False):
    """Equivalent of MLP.forward: flatten leading dims, run layers, reshape."""
    lead_shape = x.shape[:-1]
    in_dim = params[0]["in_dim"]
    out_dim = params[-1]["out_dim"]
    k0_pad = params[0]["w"].shape[0]
    n_last_pad = params[-1]["w"].shape[1]
    max_npad = max(p["w"].shape[1] for p in params)
    compute_dtype = params[0]["w"].dtype

    h = x.reshape(-1, x.shape[-1])
    m = h.shape[0]
    x_isz = jnp.dtype(h.dtype).itemsize
    out_isz = jnp.dtype(x.dtype).itemsize

    capacity = _vmem_capacity_bytes()

    # --- fused-path VMEM estimate: single-buffered weights + double-buffered
    #     x/out tiles + per-layer f32/bf16 intermediates + margin.
    m_pad_f, tm_f = _row_tiling(m, _FUSED_ROW_TILE)
    w_bytes = sum(p["w"].size * p["w"].dtype.itemsize
                  + p["b"].size * p["b"].dtype.itemsize for p in params)
    est = (w_bytes
           + 2 * tm_f * k0_pad * x_isz
           + 2 * tm_f * n_last_pad * out_isz
           + tm_f * max_npad * 12
           + (2 << 20))
    use_fused = est <= int(0.8 * capacity)

    if use_fused:
        m_pad, tm = m_pad_f, tm_f
    else:
        m_pad, tm = _row_tiling(m, _FALLBACK_ROW_TILE)

    # Skip padding entirely when already aligned (no extra HBM pass).
    if m_pad != m or k0_pad != in_dim:
        h = jnp.pad(h, ((0, m_pad - m), (0, k0_pad - in_dim)))

    if use_fused:
        # One launch for the whole MLP; activations never leave VMEM.
        vmem_limit = min(int(capacity * 0.9), max(int(est * 1.25), 32 << 20))
        y = _fused_mlp(h, [p["w"] for p in params], [p["b"] for p in params],
                       act=act, approx_gelu=approx_gelu,
                       out_dtype=x.dtype, tm=tm, vmem_limit=vmem_limit)
    else:
        # Weights too large to keep resident: per-layer (M, N, K)-tiled kernel.
        n_layers = len(params)
        for i, p in enumerate(params):
            is_last = i == n_layers - 1
            h = _tiled_linear(h, p["w"], p["b"],
                              act=None if is_last else act,
                              approx_gelu=approx_gelu,
                              out_dtype=x.dtype if is_last else compute_dtype,
                              tm=tm, capacity=capacity)
        y = h

    return y[:m, :out_dim].reshape(*lead_shape, out_dim)


# ----------------------------- pure-JAX reference --------------------------
def mlp_reference(x, params, act="gelu"):
    lead_shape = x.shape[:-1]
    h = x.reshape(-1, x.shape[-1]).astype(jnp.float32)
    n_layers = len(params)
    for i, p in enumerate(params):
        w = p["w"].astype(jnp.float32)[:p["in_dim"], :p["out_dim"]]
        b = p["b"][0, :p["out_dim"]]
        h = h @ w + b
        if i < n_layers - 1:
            h = _apply_act(h, act, approx_gelu=False)
    return h.reshape(*lead_shape, -1)


# ---------------------------------- main -----------------------------------
if __name__ == "__main__":
    key = jax.random.PRNGKey(0)

    in_dim, out_dim = 16, 4
    hidden_list = [32, 32]
    batch, seq = 2, 8

    k_x, k_p = jax.random.split(key)
    x = jax.random.normal(k_x, (batch, seq, in_dim), dtype=jnp.float32)
    params = init_mlp_params(k_p, in_dim, out_dim, hidden_list)

    # params captured as closure constants -> layer dims stay static under jit.
    mlp = jax.jit(lambda inp: mlp_forward(inp, params, act="gelu"))
    y = jax.block_until_ready(mlp(x))

    assert y.shape == (batch, seq, out_dim), y.shape
    assert bool(jnp.all(jnp.isfinite(y)))

    y_ref = mlp_reference(x, params, act="gelu")
    max_err = float(jnp.max(jnp.abs(y - y_ref)))
    assert max_err < 5e-2, f"max abs err {max_err}"

    print("KERNEL_OK")
</pallas_src>

<mosaic_0001>
module attributes {stable_mosaic.version = 11 : i64} {
  func.func @_fused_mlp_kernel(%arg0: i32, %arg1: memref<16x128xf32, #tpu.memory_space<vmem>>, %arg2: memref<128x128xbf16, #tpu.memory_space<vmem>>, %arg3: memref<1x128xf32, #tpu.memory_space<vmem>>, %arg4: memref<128x128xbf16, #tpu.memory_space<vmem>>, %arg5: memref<1x128xf32, #tpu.memory_space<vmem>>, %arg6: memref<128x128xbf16, #tpu.memory_space<vmem>>, %arg7: memref<1x128xf32, #tpu.memory_space<vmem>>, %arg8: memref<16x128xf32, #tpu.memory_space<vmem>>) attributes {dimension_semantics = [#tpu.dimension_semantics<parallel>], iteration_bounds = array<i64: 1>, scalar_prefetch = 0 : i64, scratch_operands = 0 : i64, tpu.core_type = #tpu.core_type<tc>, window_params = [{transform_indices = @transform_0, window_bounds = array<i64: 16, 128>}, {pipeline_mode = #tpu.pipeline_mode<synchronous>, transform_indices = @transform_1, window_bounds = array<i64: 128, 128>}, {pipeline_mode = #tpu.pipeline_mode<synchronous>, transform_indices = @transform_2, window_bounds = array<i64: 1, 128>}, {pipeline_mode = #tpu.pipeline_mode<synchronous>, transform_indices = @transform_3, window_bounds = array<i64: 128, 128>}, {pipeline_mode = #tpu.pipeline_mode<synchronous>, transform_indices = @transform_4, window_bounds = array<i64: 1, 128>}, {pipeline_mode = #tpu.pipeline_mode<synchronous>, transform_indices = @transform_5, window_bounds = array<i64: 128, 128>}, {pipeline_mode = #tpu.pipeline_mode<synchronous>, transform_indices = @transform_6, window_bounds = array<i64: 1, 128>}, {transform_indices = @transform_7, window_bounds = array<i64: 16, 128>}]} {
    %c0 = arith.constant 0 : index
    %c0_0 = arith.constant 0 : index
    %0 = vector.load %arg1[%c0, %c0_0] : memref<16x128xf32, #tpu.memory_space<vmem>>, vector<16x128xf32>
    %1 = arith.truncf %0 : vector<16x128xf32> to vector<16x128xbf16>
    %c0_1 = arith.constant 0 : index
    %c0_2 = arith.constant 0 : index
    %2 = vector.load %arg2[%c0_1, %c0_2] : memref<128x128xbf16, #tpu.memory_space<vmem>>, vector<128x128xbf16>
    %c0_3 = arith.constant 0 : index
    %c0_4 = arith.constant 0 : index
    %3 = vector.load %arg3[%c0_3, %c0_4] : memref<1x128xf32, #tpu.memory_space<vmem>>, vector<1x128xf32>
    %cst = arith.constant dense<0.000000e+00> : vector<16x128xf32>
    %4 = tpu.matmul %1, %2, %cst {dimension_numbers = #tpu.dot_dimension_numbers<[1], [0], [0], [1], [0, 0, 1, 1], [], []>} : vector<16x128xbf16>, vector<128x128xbf16>, vector<16x128xf32> -> vector<16x128xf32>
    %5 = vector.broadcast %3 : vector<1x128xf32> to vector<16x128xf32>
    %6 = arith.addf %4, %5 : vector<16x128xf32>
    %cst_5 = arith.constant 5.000000e-01 : f32
    %7 = vector.broadcast %cst_5 : f32 to vector<16x128xf32>
    %8 = arith.mulf %7, %6 : vector<16x128xf32>
    %cst_6 = arith.constant 0.707106769 : f32
    %9 = vector.broadcast %cst_6 : f32 to vector<16x128xf32>
    %10 = arith.mulf %6, %9 : vector<16x128xf32>
    %11 = math.erf %10 : vector<16x128xf32>
    %cst_7 = arith.constant 1.000000e+00 : f32
    %12 = vector.broadcast %cst_7 : f32 to vector<16x128xf32>
    %13 = arith.addf %12, %11 : vector<16x128xf32>
    %14 = arith.mulf %8, %13 : vector<16x128xf32>
    %15 = arith.truncf %14 : vector<16x128xf32> to vector<16x128xbf16>
    %c0_8 = arith.constant 0 : index
    %c0_9 = arith.constant 0 : index
    %16 = vector.load %arg4[%c0_8, %c0_9] : memref<128x128xbf16, #tpu.memory_space<vmem>>, vector<128x128xbf16>
    %c0_10 = arith.constant 0 : index
    %c0_11 = arith.constant 0 : index
    %17 = vector.load %arg5[%c0_10, %c0_11] : memref<1x128xf32, #tpu.memory_space<vmem>>, vector<1x128xf32>
    %cst_12 = arith.constant dense<0.000000e+00> : vector<16x128xf32>
    %18 = tpu.matmul %15, %16, %cst_12 {dimension_numbers = #tpu.dot_dimension_numbers<[1], [0], [0], [1], [0, 0, 1, 1], [], []>} : vector<16x128xbf16>, vector<128x128xbf16>, vector<16x128xf32> -> vector<16x128xf32>
    %19 = vector.broadcast %17 : vector<1x128xf32> to vector<16x128xf32>
    %20 = arith.addf %18, %19 : vector<16x128xf32>
    %cst_13 = arith.constant 5.000000e-01 : f32
    %21 = vector.broadcast %cst_13 : f32 to vector<16x128xf32>
    %22 = arith.mulf %21, %20 : vector<16x128xf32>
    %cst_14 = arith.constant 0.707106769 : f32
    %23 = vector.broadcast %cst_14 : f32 to vector<16x128xf32>
    %24 = arith.mulf %20, %23 : vector<16x128xf32>
    %25 = math.erf %24 : vector<16x128xf32>
    %cst_15 = arith.constant 1.000000e+00 : f32
    %26 = vector.broadcast %cst_15 : f32 to vector<16x128xf32>
    %27 = arith.addf %26, %25 : vector<16x128xf32>
    %28 = arith.mulf %22, %27 : vector<16x128xf32>
    %29 = arith.truncf %28 : vector<16x128xf32> to vector<16x128xbf16>
    %c0_16 = arith.constant 0 : index
    %c0_17 = arith.constant 0 : index
    %30 = vector.load %arg6[%c0_16, %c0_17] : memref<128x128xbf16, #tpu.memory_space<vmem>>, vector<128x128xbf16>
    %c0_18 = arith.constant 0 : index
    %c0_19 = arith.constant 0 : index
    %31 = vector.load %arg7[%c0_18, %c0_19] : memref<1x128xf32, #tpu.memory_space<vmem>>, vector<1x128xf32>
    %cst_20 = arith.constant dense<0.000000e+00> : vector<16x128xf32>
    %32 = tpu.matmul %29, %30, %cst_20 {dimension_numbers = #tpu.dot_dimension_numbers<[1], [0], [0], [1], [0, 0, 1, 1], [], []>} : vector<16x128xbf16>, vector<128x128xbf16>, vector<16x128xf32> -> vector<16x128xf32>
    %33 = vector.broadcast %31 : vector<1x128xf32> to vector<16x128xf32>
    %34 = arith.addf %32, %33 : vector<16x128xf32>
    %c0_21 = arith.constant 0 : index
    %c0_22 = arith.constant 0 : index
    %35 = vector.load %arg8[%c0_21, %c0_22] : memref<16x128xf32, #tpu.memory_space<vmem>>, vector<16x128xf32>
    tpu.vector_store %arg8[%c0_21, %c0_22], %34 {strides = array<i32>} : memref<16x128xf32, #tpu.memory_space<vmem>>, vector<16x128xf32>,
    return
  }
  func.func @transform_0(%arg0: i32) -> (i32, i32) {
    %c0_i32 = arith.constant 0 : i32
    %c0_i32_0 = arith.constant 0 : i32
    return %arg0, %c0_i32 : i32, i32
  }
  func.func @transform_1(%arg0: i32) -> (i32, i32) {
    %c0_i32 = arith.constant 0 : i32
    %c0_i32_0 = arith.constant 0 : i32
    %c0_i32_1 = arith.constant 0 : i32
    return %c0_i32, %c0_i32_0 : i32, i32
  }
  func.func @transform_2(%arg0: i32) -> (i32, i32) {
    %c0_i32 = arith.constant 0 : i32
    %c0_i32_0 = arith.constant 0 : i32
    %c0_i32_1 = arith.constant 0 : i32
    return %c0_i32, %c0_i32_0 : i32, i32
  }
  func.func @transform_3(%arg0: i32) -> (i32, i32) {
    %c0_i32 = arith.constant 0 : i32
    %c0_i32_0 = arith.constant 0 : i32
    %c0_i32_1 = arith.constant 0 : i32
    return %c0_i32, %c0_i32_0 : i32, i32
  }
  func.func @transform_4(%arg0: i32) -> (i32, i32) {
    %c0_i32 = arith.constant 0 : i32
    %c0_i32_0 = arith.constant 0 : i32
    %c0_i32_1 = arith.constant 0 : i32
    return %c0_i32, %c0_i32_0 : i32, i32
  }
  func.func @transform_5(%arg0: i32) -> (i32, i32) {
    %c0_i32 = arith.constant 0 : i32
    %c0_i32_0 = arith.constant 0 : i32
    %c0_i32_1 = arith.constant 0 : i32
    return %c0_i32, %c0_i32_0 : i32, i32
  }
  func.func @transform_6(%arg0: i32) -> (i32, i32) {
    %c0_i32 = arith.constant 0 : i32
    %c0_i32_0 = arith.constant 0 : i32
    %c0_i32_1 = arith.constant 0 : i32
    return %c0_i32, %c0_i32_0 : i32, i32
  }
  func.func @transform_7(%arg0: i32) -> (i32, i32) {
    %c0_i32 = arith.constant 0 : i32
    %c0_i32_0 = arith.constant 0 : i32
    return %arg0, %c0_i32 : i32, i32
  }
}

</mosaic_0001>

<bundles_post_ra>
// kernel: _lambda_.1
= control target key start
LH: loop header
LB: loop body
LE: loop exit
PB: predicated region body
PF: predicated region fallthrough
CT: control target
= control target key end

     0   :  { %12 = vsyncpa [#allocation3], 0  ;;  %s769_s0 = inlined_call_operand.vmem [shape: f32[16,128], index: 0, kind: input, shape index: {}]   ;;  %s770_s1 = inlined_call_operand.hbm [shape: bf16[128,128], index: 1, kind: input, shape index: {}]   ;;  %s771_s2 = inlined_call_operand.vmem [shape: f32[1,128], index: 2, kind: input, shape index: {}, may-alias: {2,4,6}]   ;;  %s772_s3 = inlined_call_operand.hbm [shape: bf16[128,128], index: 3, kind: input, shape index: {}]   ;;  %s773_s4 = inlined_call_operand.vmem [shape: f32[1,128], index: 4, kind: input, shape index: {}, may-alias: {2,4,6}]   ;;  %s774_s5 = inlined_call_operand.vmem [shape: bf16[128,128], index: 5, kind: input, shape index: {}]   ;;  %s775_s6 = inlined_call_operand.vmem [shape: f32[1,128], index: 6, kind: input, shape index: {}, may-alias: {2,4,6}]   ;;  %s776_s7 = inlined_call_operand.vmem [shape: f32[16,128], index: 7, kind: output, shape index: {}]  }
   0x1   :  { %13 = vsyncpa [#allocation5], 0  ;;  %s624_s24 = smov [#allocation2]   ;;  %s576_s28 = scalar_lea.hbm %s770_s1, 1024 }
   0x2   :  { %s21_s25 = sshll.u32 %s624_s24, 4  ;;  %p577_p0 = scmp.ne.s32.totalorder %s770_s1, %s576_s28  ;;  %s22_s25 = int_to_ptr.vmem [resolvable:$true] %s21_s25 }
   0x3   :  { %p580_p1 = scmp.lt.u32.totalorder %s576_s28, %s770_s1 }
   0x5   :  { %p582_p2 = pnand %p580_p1, %p577_p0 }
   0x7   :  { %585 = shalt.err (!%p582_p2)
}
   0x8   :  { %s586_s10 = scalar_lea.vmem %s22_s25, 1024  ;;  %p591_p4 = scmp.lt.s32.totalorder %s22_s25, %s22_s25 }
   0x9   :  { %p587_p3 = scmp.ne.s32.totalorder %s22_s25, %s586_s10  ;;  %p592_p5 = scmp.lt.s32.totalorder %s586_s10, %s586_s10 }
   0xb   :  { %p593_p6 = por %p592_p5, %p591_p4 }
   0xd   :  { %p594_p7 = pnand %p593_p6, %p587_p3 }
   0xf   :  { %597 = shalt.err (!%p594_p7)
}
  0x10   :  { %s625_s11 = smov 64   ;;  %s626_s12 = smov 4  }
  0x11   :  { %27 = dma.hbm_to_vmem [thread:$0]  %s770_s1, 1024, %s22_s25, [#allocation3], %s625_s11, %s625_s11, %s626_s12  }
  0x12   :  { %s627_s15 = smov [#allocation4]   ;;  %s598_s19 = scalar_lea.hbm %s772_s3, 1024 }
  0x13   :  { %s35_s16 = sshll.u32 %s627_s15, 4  ;;  %p599_p8 = scmp.ne.s32.totalorder %s772_s3, %s598_s19  ;;  %s36_s16 = int_to_ptr.vmem [resolvable:$true] %s35_s16 }
  0x14   :  { %p602_p9 = scmp.lt.u32.totalorder %s598_s19, %s772_s3 }
  0x16   :  { %p604_p10 = pnand %p602_p9, %p599_p8 }
  0x18   :  { %607 = shalt.err (!%p604_p10)
}
  0x19   :  { %s608_s24 = scalar_lea.vmem %s36_s16, 1024  ;;  %p613_p12 = scmp.lt.s32.totalorder %s36_s16, %s36_s16 }
  0x1a   :  { %p609_p11 = scmp.ne.s32.totalorder %s36_s16, %s608_s24  ;;  %p614_p13 = scmp.lt.s32.totalorder %s608_s24, %s608_s24 }
  0x1c   :  { %p615_p0 = por %p614_p13, %p613_p12 }
  0x1e   :  { %p616_p1 = pnand %p615_p0, %p609_p11 }
  0x20   :  { %619 = shalt.err (!%p616_p1)
}
  0x21   :  { %41 = dma.hbm_to_vmem [thread:$0]  %s772_s3, 1024, %s36_s16, [#allocation5], %s625_s11, %s625_s11, %s626_s12  }
  0x22   :  { %620 = dma.done.wait [#allocation3], 1024  }
  0x23   :  { %621 = vsyncadd [#allocation3], 4294966272 }
  0x24   :  { %622 = dma.done.wait [#allocation5], 1024  }
  0x25   :  { %623 = vsyncadd [#allocation5], 4294966272  ;;  %v628_v0 = vmov 0.0   ;;  %vm629_vm0 = vmmov 0   ;;  %v544_v1 = vld [vmem:[#allocation2] sm:$0xff]   ;;  %v545_v2 = vld [vmem:[#allocation2 + $0x8] sm:$0xff]  }
  0x26   :  { %478 = vmatprep.subr.bf16.mxu0 %v628_v0  ;;  %494 = vmatprep.mubr.msk.bf16.mxu0 %vm629_vm0, %v628_v0  ;;  %v546_v3 = vld [vmem:[#allocation2 + $0x10] sm:$0xff]   ;;  %v552_v4 = vld [vmem:[#allocation4] sm:$0xff]   ;;  %v547_v5 = vld [vmem:[#allocation2 + $0x18] sm:$0xff]  }
  0x27   :  { %498 = vmatprep.subr.bf16.mxu1 %v628_v0  ;;  %514 = vmatprep.mubr.msk.bf16.mxu1 %vm629_vm0, %v628_v0  ;;  %v553_v6 = vld [vmem:[#allocation4 + $0x8] sm:$0xff]   ;;  %v548_v7 = vld [vmem:[#allocation2 + $0x20] sm:$0xff]   ;;  %v550_v9 = vld [vmem:[#allocation2 + $0x30] sm:$0xff]  }
  0x28   :  { %479 = vmatpush3.bf16.msra.mxu0 %v544_v1  ;;  %499 = vmatpush3.bf16.msra.mxu1 %v552_v4  ;;  %v549_v8 = vld [vmem:[#allocation2 + $0x28] sm:$0xff]   ;;  %v551_v10 = vld [vmem:[#allocation2 + $0x38] sm:$0xff]   ;;  %v55_v11 = vld [vmem:[%s769_s0] sm:$0xff] }
  0x29   :  { %480 = vmatprep.subr.bf16.mxu0 %v628_v0  ;;  %500 = vmatprep.subr.bf16.mxu1 %v628_v0  ;;  %v56_v12 = vld [vmem:[%s769_s0 + $0x8] sm:$0xff]  ;;  %v554_v14 = vld [vmem:[#allocation4 + $0x10] sm:$0xff]   ;;  %v555_v15 = vld [vmem:[#allocation4 + $0x18] sm:$0xff]  }
  0x2a   :  { %v57_v13 = vpack.c.bf16 %v56_v12, %v55_v11  ;;  %v556_v16 = vld [vmem:[#allocation4 + $0x20] sm:$0xff]   ;;  %v557_v17 = vld [vmem:[#allocation4 + $0x28] sm:$0xff]   ;;  %v558_v18 = vld [vmem:[#allocation4 + $0x30] sm:$0xff]  }
  0x2b   :  { %v559_v19 = vld [vmem:[#allocation4 + $0x38] sm:$0xff]   ;;  %v560_v20 = vld [vmem:[%s774_s5] sm:$0xff]   ;;  %v561_v21 = vld [vmem:[%s774_s5 + $0x8] sm:$0xff]  }
  0x2c   :  { %481 = vmatpush3.bf16.msra.mxu0 %v545_v2  ;;  %501 = vmatpush3.bf16.msra.mxu1 %v553_v6  ;;  %v424_v22 = vld [vmem:[%s771_s2] ss:$0 sm:$0xff]  ;;  %v562_v40 = vld [vmem:[%s774_s5 + $0x10] sm:$0xff]   ;;  %v563_v41 = vld [vmem:[%s774_s5 + $0x18] sm:$0xff]  }
  0x2d   :  { %482 = vmatprep.subr.bf16.mxu0 %v628_v0  ;;  %502 = vmatprep.subr.bf16.mxu1 %v628_v0  ;;  %v564_v42 = vld [vmem:[%s774_s5 + $0x20] sm:$0xff]   ;;  %v565_v43 = vld [vmem:[%s774_s5 + $0x28] sm:$0xff]   ;;  %v566_v44 = vld [vmem:[%s774_s5 + $0x30] sm:$0xff]  }
  0x2e   :  { %v567_v45 = vld [vmem:[%s774_s5 + $0x38] sm:$0xff]   ;;  %v433_v46 = vld [vmem:[%s773_s4] ss:$0 sm:$0xff] }
  0x30   :  { %483 = vmatpush3.bf16.msra.mxu0 %v546_v3  ;;  %503 = vmatpush3.bf16.msra.mxu1 %v554_v14 }
  0x31   :  { %484 = vmatprep.subr.bf16.mxu0 %v628_v0  ;;  %504 = vmatprep.subr.bf16.mxu1 %v628_v0 }
  0x34   :  { %485 = vmatpush3.bf16.msra.mxu0 %v547_v5  ;;  %505 = vmatpush3.bf16.msra.mxu1 %v555_v15 }
  0x35   :  { %486 = vmatprep.subr.bf16.mxu0 %v628_v0  ;;  %506 = vmatprep.subr.bf16.mxu1 %v628_v0 }
  0x38   :  { %487 = vmatpush3.bf16.msra.mxu0 %v548_v7  ;;  %507 = vmatpush3.bf16.msra.mxu1 %v556_v16 }
  0x39   :  { %488 = vmatprep.subr.bf16.mxu0 %v628_v0  ;;  %508 = vmatprep.subr.bf16.mxu1 %v628_v0 }
  0x3c   :  { %489 = vmatpush3.bf16.msra.mxu0 %v549_v8  ;;  %509 = vmatpush3.bf16.msra.mxu1 %v557_v17 }
  0x3d   :  { %490 = vmatprep.subr.bf16.mxu0 %v628_v0  ;;  %510 = vmatprep.subr.bf16.mxu1 %v628_v0 }
  0x40   :  { %491 = vmatpush3.bf16.msra.mxu0 %v550_v9  ;;  %511 = vmatpush3.bf16.msra.mxu1 %v558_v18 }
  0x41   :  { %492 = vmatprep.subr.bf16.mxu0 %v628_v0  ;;  %512 = vmatprep.subr.bf16.mxu1 %v628_v0 }
  0x44   :  { %493 = vmatpush3.bf16.msra.mxu0 %v551_v10  ;;  %513 = vmatpush3.bf16.msra.mxu1 %v559_v19 }
  0x45   :  { %518 = vmatprep.subr.bf16.mxu0 %v628_v0 }
  0x47   :  { %495 = vmatmul.mubr.bf16.vlgmr.msra.gmra.mrb[0].mxu0 %v57_v13 }
  0x48   :  { %534 = vmatprep.mubr.msk.bf16.mxu0 %vm629_vm0, %v628_v0  ;;  %519 = vmatpush3.bf16.msra.mxu0 %v560_v20 }
  0x49   :  { %520 = vmatprep.subr.bf16.mxu0 %v628_v0 }
  0x4c   :  { %521 = vmatpush3.bf16.msra.mxu0 %v561_v21 }
  0x4d   :  { %522 = vmatprep.subr.bf16.mxu0 %v628_v0 }
  0x50   :  { %523 = vmatpush3.bf16.msra.mxu0 %v562_v40 }
  0x51   :  { %524 = vmatprep.subr.bf16.mxu0 %v628_v0 }
  0x54   :  { %525 = vmatpush3.bf16.msra.mxu0 %v563_v41 }
  0x55   :  { %526 = vmatprep.subr.bf16.mxu0 %v628_v0 }
  0x58   :  { %527 = vmatpush3.bf16.msra.mxu0 %v564_v42 }
  0x59   :  { %528 = vmatprep.subr.bf16.mxu0 %v628_v0 }
  0x5c   :  { %529 = vmatpush3.bf16.msra.mxu0 %v565_v43 }
  0x5d   :  { %530 = vmatprep.subr.bf16.mxu0 %v628_v0 }
  0x60   :  { %531 = vmatpush3.bf16.msra.mxu0 %v566_v44 }
  0x61   :  { %532 = vmatprep.subr.bf16.mxu0 %v628_v0  ;;  %v442_v0 = vld [vmem:[%s775_s6] ss:$0 sm:$0xff] }
  0x64   :  { %533 = vmatpush3.bf16.msra.mxu0 %v567_v45 }
 0x11a   :  { %v163_v23 = vpop.f32.mrb[0].mxu0 }
 0x11b   :  { %v164_v24 = vadd.f32 %v424_v22, %v163_v23  ;;  %v496_v25 = vpop.f32.mrb[1].mxu0 }
 0x11c   :  { %v166_v26 = vpop.f32.mrb[2].mxu0 }
 0x11d   :  { %v172_v27 = vmul.f32 0.70710677, %v164_v24  ;;  %v167_v28 = vadd.f32 %v424_v22, %v166_v26  ;;  %v497_v29 = vpop.f32.mrb[3].mxu0  ;;  %v170_v34 = vmul.f32 0.5, %v164_v24 }
 0x11f   :  { %568 = verf.f32 %v172_v27  ;;  %v173_v30 = vmul.f32 0.70710677, %v167_v28  ;;  %v171_v35 = vmul.f32 0.5, %v167_v28 }
 0x121   :  { %570 = verf.f32 %v173_v30 }
 0x129   :  { %v569_v31 = vpop.eup %568 }
 0x12a   :  { %v176_v32 = vadd.f32 1.0, %v569_v31 }
 0x12b   :  { %v571_v33 = vpop.eup %570 }
 0x12c   :  { %v177_v36 = vadd.f32 1.0, %v571_v33  ;;  %v178_v37 = vmul.f32 %v176_v32, %v170_v34 }
 0x12e   :  { %v179_v38 = vmul.f32 %v177_v36, %v171_v35 }
 0x130   :  { %v180_v39 = vpack.c.bf16 %v179_v38, %v178_v37 }
 0x132   :  { %515 = vmatmul.mubr.bf16.vlgmr.msra.gmra.mrb[0].mxu1 %v180_v39 }
 0x205   :  { %v286_v47 = vpop.f32.mrb[0].mxu1 }
 0x206   :  { %v287_v48 = vadd.f32 %v433_v46, %v286_v47  ;;  %v516_v49 = vpop.f32.mrb[1].mxu1 }
 0x207   :  { %v289_v50 = vpop.f32.mrb[2].mxu1 }
 0x208   :  { %v295_v51 = vmul.f32 0.70710677, %v287_v48  ;;  %v290_v52 = vadd.f32 %v433_v46, %v289_v50  ;;  %v517_v53 = vpop.f32.mrb[3].mxu1  ;;  %v293_v58 = vmul.f32 0.5, %v287_v48 }
 0x20a   :  { %572 = verf.f32 %v295_v51  ;;  %v296_v54 = vmul.f32 0.70710677, %v290_v52  ;;  %v294_v59 = vmul.f32 0.5, %v290_v52 }
 0x20c   :  { %574 = verf.f32 %v296_v54 }
 0x214   :  { %v573_v55 = vpop.eup %572 }
 0x215   :  { %v299_v56 = vadd.f32 1.0, %v573_v55 }
 0x216   :  { %v575_v57 = vpop.eup %574 }
 0x217   :  { %v300_v60 = vadd.f32 1.0, %v575_v57  ;;  %v301_v61 = vmul.f32 %v299_v56, %v293_v58 }
 0x219   :  { %v302_v62 = vmul.f32 %v300_v60, %v294_v59 }
 0x21b   :  { %v303_v63 = vpack.c.bf16 %v302_v62, %v301_v61 }
 0x21d   :  { %535 = vmatmul.mubr.bf16.vlgmr.msra.gmra.mrb[4].mxu0 %v303_v63 }
 0x2f0   :  { %v409_v1 = vpop.f32.mrb[4].mxu0 }
 0x2f1   :  { %v410_v2 = vadd.f32 %v442_v0, %v409_v1  ;;  %v536_v3 = vpop.f32.mrb[5].mxu0 }
 0x2f2   :  { %v412_v4 = vpop.f32.mrb[6].mxu0 }
 0x2f3   :  { %416 = vst [vmem:[%s776_s7] sm:$0xff] %v410_v2  ;;  %v413_v5 = vadd.f32 %v442_v0, %v412_v4  ;;  %v537_v6 = vpop.f32.mrb[7].mxu0 }
 0x2f5   :  { %417 = vst [vmem:[%s776_s7 + $0x8] sm:$0xff] %v413_v5 }
 0x2f6   :  { %422 = vsyncpa [#allocation3], 1 }
 0x2f7   :  { %423 = vsyncpa [#allocation5], 1 }

</bundles_post_ra>
